<compile_context>
chip_gen: v7x
topology: tpu7x:2x2x1
jax: 0.10.0
libtpu: 0.0.40
codegen_flags: <defaults>
</compile_context>

<pallas_src>
import functools

import jax
import jax.numpy as jnp
from jax.experimental import pallas as pl
from jax.experimental.pallas import tpu as pltpu


def _rmsnorm_kernel(x_ref, w_ref, o_ref, *, eps, inv_dim, fuse_weight_in_f32):
    # x_ref: (block_rows, dim_p), w_ref: (1, dim_p) in out dtype,
    # o_ref: (block_rows, dim_p).  Padded lanes of x are zero, so the sum over
    # the padded width combined with the true-dim reciprocal gives the exact
    # mean over the original `dim`.
    x = x_ref[...]
    xf = x.astype(jnp.float32)
    ms = jnp.sum(xf * xf, axis=-1, keepdims=True) * inv_dim
    inv = jax.lax.rsqrt(ms + eps)                       # EUP slot (free-ish)
    if fuse_weight_in_f32:
        # Opt-in: single downcast at the store (saves bf16 pack/unpack on v5e).
        # Slightly reorders the cast vs. PyTorch's .type_as-before-weight.
        o_ref[...] = (xf * inv * w_ref[...].astype(jnp.float32)).astype(o_ref.dtype)
    else:
        normed = (xf * inv).astype(x.dtype)             # .type_as(x) BEFORE weight
        o_ref[...] = normed.astype(o_ref.dtype) * w_ref[...]


def rms_norm(x, weight=None, eps=1e-6, block_rows=None, fuse_weight_in_f32=False):
    """x: (..., dim); weight: (dim,) or None (elementwise_affine=False)."""
    orig_shape = x.shape
    dim = orig_shape[-1]
    rows = 1
    for s in orig_shape[:-1]:
        rows *= s
    rows = max(rows, 1)

    if weight is None:
        # elementwise_affine=False: multiply by exact ones (no numeric change).
        weight = jnp.ones((dim,), dtype=x.dtype)
    out_dtype = jnp.result_type(x.dtype, weight.dtype)

    # NOTE: x is expected in its natural contiguous layout so this reshape is
    # a bitcast (no HBM copy); hand transposed views to the producer fusion.
    x2d = x.reshape(rows, dim)

    # ---- Lane-dense layout: pad last dim to a multiple of 128 --------------
    LANES = 128
    dim_p = ((dim + LANES - 1) // LANES) * LANES
    if dim_p != dim:
        x2d = jnp.pad(x2d, ((0, 0), (0, dim_p - dim)))  # zeros keep stats exact
        weight_p = jnp.pad(weight, (0, dim_p - dim))
    else:
        weight_p = weight
    w2d = weight_p.astype(out_dtype).reshape(1, dim_p)   # hoist cast out of kernel

    in_item = x2d.dtype.itemsize
    out_item = jnp.dtype(out_dtype).itemsize
    sublane = max(8, 32 // in_item)                      # f32->8, bf16->16, int8->32

    # ---- VMEM budget (v7x has only 64 MiB physical) -------------------------
    try:
        vmem_cap = int(pltpu.get_tpu_info().vmem_capacity_bytes)
    except Exception:  # pragma: no cover - conservative fallback
        vmem_cap = 64 << 20
    tile_budget = int(vmem_cap * 0.55)

    if block_rows is None:
        # Per-row bytes: double-buffered input + output tiles PLUS the f32
        # working set Mosaic materializes for intermediates (~2 live f32 arrays).
        per_row = dim_p * (2 * in_item + 2 * out_item + 2 * 4)
        br = max(sublane, tile_budget // per_row)
        br = min(br, 8192)                               # byte budget is the real cap
        br = (br // sublane) * sublane
        rows_rounded = ((rows + sublane - 1) // sublane) * sublane
        block_rows = max(sublane, min(br, rows_rounded))

    # Megacore: v7x has 2 TensorCores; keep >= 4 blocks so both get work.
    MIN_BLOCKS = 4
    if rows > sublane and pl.cdiv(rows, block_rows) < MIN_BLOCKS:
        shrunk = ((pl.cdiv(rows, MIN_BLOCKS) + sublane - 1) // sublane) * sublane
        block_rows = max(sublane, min(block_rows, shrunk))

    grid = (pl.cdiv(rows, block_rows),)   # ragged last block: per-row math is
                                          # independent; OOB writes are dropped.

    # Scoped VMEM limit sized to the actual footprint, capped safely below
    # physical VMEM on every generation.
    est = block_rows * dim_p * (2 * in_item + 2 * out_item + 2 * 4) + 2 * dim_p * out_item
    vmem_limit = int(min(est + (4 << 20), int(0.75 * vmem_cap)))
    vmem_limit = max(vmem_limit, 32 << 20)
    vmem_limit = min(vmem_limit, vmem_cap - (8 << 20))

    # Advisory cost for XLA's scheduler (purely HBM-bound kernel).
    cost = pl.CostEstimate(
        flops=4 * rows * dim,
        transcendentals=rows,
        bytes_accessed=rows * dim * (in_item + out_item) + dim * out_item,
    )

    # TODO(synk): the weight could be single-buffered (pipeline_mode=pl.Buffered(1))
    # since its index_map is constant; skipped to keep compile risk minimal.
    out2d = pl.pallas_call(
        functools.partial(
            _rmsnorm_kernel,
            eps=eps,
            inv_dim=1.0 / float(dim),
            fuse_weight_in_f32=fuse_weight_in_f32,
        ),
        out_shape=jax.ShapeDtypeStruct((rows, dim_p), out_dtype),
        grid_spec=pltpu.PrefetchScalarGridSpec(
            num_scalar_prefetch=0,
            grid=grid,
            in_specs=[
                pl.BlockSpec((block_rows, dim_p), lambda i: (i, 0)),
                pl.BlockSpec((1, dim_p), lambda i: (0, 0)),
            ],
            out_specs=pl.BlockSpec((block_rows, dim_p), lambda i: (i, 0)),
        ),
        compiler_params=pltpu.CompilerParams(
            dimension_semantics=("parallel",),
            vmem_limit_bytes=vmem_limit,
        ),
        cost_estimate=cost,
    )(x2d, w2d)

    if dim_p != dim:
        out2d = out2d[:, :dim]
    return out2d.reshape(orig_shape)


def rms_norm_ref(x, weight, eps=1e-6):
    xf = x.astype(jnp.float32)
    inv = jax.lax.rsqrt(jnp.mean(xf * xf, axis=-1, keepdims=True) + eps)
    normed = (xf * inv).astype(x.dtype)
    if weight is None:
        return normed
    out_dtype = jnp.result_type(x.dtype, weight.dtype)
    return normed.astype(out_dtype) * weight.astype(out_dtype)


if __name__ == "__main__":
    key = jax.random.PRNGKey(0)
    batch, seq, hidden = 2, 8, 32

    x = jax.random.normal(key, (batch, seq, hidden), dtype=jnp.float32)
    # deterministic parameter init: torch.ones(dim)
    weight = jnp.ones((hidden,), dtype=jnp.float32)

    y = rms_norm(x, weight, eps=1e-6)
    y = jax.block_until_ready(y)

    y_ref = rms_norm_ref(x, weight, eps=1e-6)
    assert y.shape == x.shape and y.dtype == y_ref.dtype
    assert jnp.allclose(y, y_ref, atol=1e-5, rtol=1e-5)

    print("KERNEL_OK")
</pallas_src>

<mosaic_0001>
module attributes {stable_mosaic.version = 11 : i64} {
  func.func @_rmsnorm_kernel(%arg0: i32, %arg1: memref<8x128xf32, #tpu.memory_space<vmem>>, %arg2: memref<1x128xf32, #tpu.memory_space<vmem>>, %arg3: memref<8x128xf32, #tpu.memory_space<vmem>>) attributes {dimension_semantics = [#tpu.dimension_semantics<parallel>], iteration_bounds = array<i64: 2>, scalar_prefetch = 0 : i64, scratch_operands = 0 : i64, tpu.core_type = #tpu.core_type<tc>, window_params = [{transform_indices = @transform_0, window_bounds = array<i64: 8, 128>}, {pipeline_mode = #tpu.pipeline_mode<synchronous>, transform_indices = @transform_1, window_bounds = array<i64: 1, 128>}, {transform_indices = @transform_2, window_bounds = array<i64: 8, 128>}]} {
    %c0 = arith.constant 0 : index
    %c0_0 = arith.constant 0 : index
    %0 = vector.load %arg1[%c0, %c0_0] : memref<8x128xf32, #tpu.memory_space<vmem>>, vector<8x128xf32>
    %1 = arith.mulf %0, %0 : vector<8x128xf32>
    %cst = arith.constant dense<0.000000e+00> : vector<8xf32>
    %2 = vector.multi_reduction <add>, %1, %cst [1] : vector<8x128xf32> to vector<8xf32>
    %3 = vector.shape_cast %2 : vector<8xf32> to vector<8x1xf32>
    %cst_1 = arith.constant 3.125000e-02 : f32
    %4 = vector.broadcast %cst_1 : f32 to vector<8x1xf32>
    %5 = arith.mulf %3, %4 : vector<8x1xf32>
    %cst_2 = arith.constant 9.99999997E-7 : f32
    %6 = vector.broadcast %cst_2 : f32 to vector<8x1xf32>
    %7 = arith.addf %5, %6 : vector<8x1xf32>
    %8 = math.rsqrt %7 : vector<8x1xf32>
    %9 = vector.broadcast %8 : vector<8x1xf32> to vector<8x128xf32>
    %10 = arith.mulf %0, %9 : vector<8x128xf32>
    %c0_3 = arith.constant 0 : index
    %c0_4 = arith.constant 0 : index
    %11 = vector.load %arg2[%c0_3, %c0_4] : memref<1x128xf32, #tpu.memory_space<vmem>>, vector<1x128xf32>
    %12 = vector.broadcast %11 : vector<1x128xf32> to vector<8x128xf32>
    %13 = arith.mulf %10, %12 : vector<8x128xf32>
    %c0_5 = arith.constant 0 : index
    %c0_6 = arith.constant 0 : index
    %14 = vector.load %arg3[%c0_5, %c0_6] : memref<8x128xf32, #tpu.memory_space<vmem>>, vector<8x128xf32>
    tpu.vector_store %arg3[%c0_5, %c0_6], %13 {strides = array<i32>} : memref<8x128xf32, #tpu.memory_space<vmem>>, vector<8x128xf32>,
    return
  }
  func.func @transform_0(%arg0: i32) -> (i32, i32) {
    %c0_i32 = arith.constant 0 : i32
    %c0_i32_0 = arith.constant 0 : i32
    return %arg0, %c0_i32 : i32, i32
  }
  func.func @transform_1(%arg0: i32) -> (i32, i32) {
    %c0_i32 = arith.constant 0 : i32
    %c0_i32_0 = arith.constant 0 : i32
    %c0_i32_1 = arith.constant 0 : i32
    return %c0_i32, %c0_i32_0 : i32, i32
  }
  func.func @transform_2(%arg0: i32) -> (i32, i32) {
    %c0_i32 = arith.constant 0 : i32
    %c0_i32_0 = arith.constant 0 : i32
    return %arg0, %c0_i32 : i32, i32
  }
}

</mosaic_0001>

<bundles_post_ra>
// kernel: tpu_custom_call.1
= control target key start
LH: loop header
LB: loop body
LE: loop exit
PB: predicated region body
PF: predicated region fallthrough
CT: control target
= control target key end

     0   :  { %7 = vsyncpa [#allocation3], 0  ;;  %s600_s0 = inlined_call_operand.hbm [shape: f32[16,128], index: 0, kind: input, shape index: {}]   ;;  %s601_s1 = inlined_call_operand.vmem [shape: f32[1,128], index: 1, kind: input, shape index: {}]   ;;  %s602_s2 = inlined_call_operand.hbm [shape: f32[16,128], index: 2, kind: output, shape index: {}]  }
   0x1   :  { %9 = vsyncpa [#allocation3 + $0x1], 0 }
   0x2   :  { %10 = vsyncpa [#allocation4], 0 }
   0x3   :  { %12 = vsyncpa [#allocation4 + $0x1], 0  ;;  %s436_s9 = smov 0   ;;  %s438_s10 = smov 0  }
   0x4   :  { %s440_s11 = smov 0   ;;  %s442_s12 = smov 0  }
   0x5 LB: > { %s457_s13 = sadd.s32 4294967295, %s417_s12   ;;  %s260_s14 = sadd.s32 4294967294, %s417_s12   ;;  %s417_s12 = sphi %s442_s12, %s617_s12   ;;  %s413_s11 = sphi %s440_s11, %s616_s11   ;;  %s409_s10 = sphi %s438_s10, %s615_s10   ;;  %s405_s9 = sphi %s436_s9, %s614_s9  }
   0x6   : > { %s461_s15 = sadd.s32 1, %s417_s12   ;;  %s25_s16 = sadd.s32 1, %s413_s11 }
   0x7   : > { %s22_s17 = ssub.s32 %s417_s12, %s461_s15  ;;  %p32_p0 = scmp.ne.s32.totalorder %s413_s11, %s409_s10 }
   0x8   : > { %p23_p1 = scmp.eq.s32.totalorder %s22_s17, 0  ;;  %p33_p2 = scmp.eq.s32.totalorder %s417_s12, 0 }
   0x9   : > { %p38_p3 = scmp.ne.s32.totalorder %s409_s10, %s405_s9  ;;  %p39_p4 = scmp.eq.s32.totalorder %s457_s13, 0 }
   0xa   : > { %s473_s18 = scalar_select %p23_p1, %s413_s11, %s25_s16  }
   0xb   : > { %p475_p5 = por %p33_p2, %p32_p0  ;;  %p479_p6 = por %p39_p4, %p38_p3 }
   0xc   : > { %p83_p7 = scmp.eq.s32.totalorder %s457_s13, 1  ;;  %p89_p8 = scmp.eq.s32.totalorder %s260_s14, 1 }
   0xd   : > { %p285_p10 = scmp.lt.s32.totalorder %s417_s12, 2  ;;  %s112_s23 = sand.u32 1, %s413_s11  }
   0xe   : > { %p486_p11 = por %p83_p7, %p32_p0  ;;  %p490_p12 = por %p89_p8, %p38_p3 }
   0xf   : > { %s264_s24 = sshll.u32 %s417_s12, 7  ;;  %s263_s25 = sshll.u32 %s112_s23, 3 }
  0x10   : > { %s606_s21 = scalar_select %p486_p11, 1, 0 }
  0x11   : > { %s607_s22 = scalar_select %p490_p12, 1, 0 }
  0x12   : > { %s499_s28 = scalar_lea.hbm %s600_s0, %s264_s24  ;;  %s116_s29 = scalar_lea.vmem [#allocation2], %s263_s25 }
  0x13   : > { %s123_s30 = sshll.u32 %s116_s29, 4  ;;  %p503_p13 = pnand %p285_p10, %p475_p5  ;;  %s507_s30 = int_to_ptr.vmem [resolvable:$true] %s123_s30 }
  0x14   : > { %s113_s4 = scalar_lea.sflag [#allocation3], %s112_s23  ;;  %s321_s5 = scalar_lea.hbm %s499_s28, 128 }
  0x15   : > { %p322_p2 = scmp.ne.s32.totalorder %s499_s28, %s321_s5  ;;  %p323_p3 = pneg %p503_p13 }
  0x16   : > { %s326_s8 = scalar_lea.hbm %s600_s0, 256  ;;  %p327_p5 = scmp.lt.u32.totalorder %s499_s28, %s600_s0 }
  0x17   : > { %p324_p4 = pnand %p323_p3, %p322_p2  ;;  %p328_p8 = scmp.lt.u32.totalorder %s326_s8, %s321_s5 }
  0x18   : > { %p330_p9 = scmp.lt.u32.totalorder %s321_s5, %s499_s28 }
  0x19   : > { %p325_p7 = pneg %p324_p4  ;;  %p329_p10 = por %p328_p8, %p327_p5 }
  0x1b   : > { %p331_p0 = por %p330_p9, %p329_p10 }
  0x1d   : > { %p332_p1 = pnand %p331_p0, %p325_p7 }
  0x1f   : > { %335 = shalt.err (!%p332_p1)
}
  0x20   : > { %s336_s17 = scalar_lea.vmem %s507_s30, 128  ;;  %s419_s19 = smov [#allocation2]  }
  0x21   : > { %p337_p2 = scmp.ne.s32.totalorder %s507_s30, %s336_s17  ;;  %s341_s23 = sshll.u32 %s419_s19, 4  ;;  %s342_s23 = int_to_ptr.vmem [resolvable:$false] %s341_s23 }
  0x22   : > { %s343_s24 = scalar_lea.vmem %s342_s23, 256  ;;  %p344_p11 = scmp.lt.s32.totalorder %s507_s30, %s342_s23 }
  0x23   : > { %p339_p4 = pnand %p337_p2, %p323_p3  ;;  %p345_p5 = scmp.lt.s32.totalorder %s343_s24, %s336_s17 }
  0x25   : > { %p340_p12 = pneg %p339_p4  ;;  %p346_p8 = por %p345_p5, %p344_p11 }
  0x27   : > { %p347_p9 = pnand %p346_p8, %p340_p12 }
  0x29   : > { %350 = shalt.err (!%p347_p9)
}
  0x2a   : > { %280 = dma.hbm_to_vmem [thread:$0]  (!%p503_p13), %s499_s28, 128, %s507_s30, %s113_s4  }
  0x2b   : > { %p609_p0 = scmp.lt.s32.totalorder %s417_s12, 3  ;;  %p610_p1 = scmp.ge.s32.totalorder %s417_s12, 1 }
  0x2d   : > { %p129_p3 = pnand %p610_p1, %p609_p0 }
  0x2e   : > { %s541_s25 = sand.u32 (!%p129_p3), 1, %s409_s10  }
  0x2f   : > { %132 = sbr.rel (%p129_p3) target bundleno = 233 (0xe9), region = 28  ;;  %s266_s26 = sshll.u32 (!%p129_p3), %s541_s25, 3 }
  0x30   : > { %s135_s27 = scalar_lea.sflag (!%p129_p3), [#allocation3], %s541_s25  ;;  %s138_s29 = scalar_lea.vmem (!%p129_p3), [#allocation2], %s266_s26 }
  0x36   : > { %396 = dma.done.wait (%p479_p6), %s135_s27, 128  }
  0x37   : > { %398 = vsyncadd (%p479_p6), %s135_s27, 4294967168  ;;  %v159_v0 = vld [vmem:[%s138_s29] sm:$0xff]  ;;  %s270_s3 = sshll.u32 %s457_s13, 7  ;;  %s158_s4 = scalar_lea.vmem [#allocation5], %s266_s26 }
  0x38   : > { %v160_v1 = vmul.f32 %v159_v0, %v159_v0  ;;  %v268_v6 = vld [vmem:[%s601_s1] ss:$0 sm:$0xff]  ;;  %s190_s5 = sshll.u32 %s158_s4, 4  ;;  %s556_s7 = scalar_lea.hbm %s602_s2, %s270_s3  ;;  %s558_s5 = int_to_ptr.vmem [resolvable:$true] %s190_s5 }
  0x39   : > { %s177_s8 = scalar_lea.sflag [#allocation4], %s541_s25  ;;  %s351_s14 = scalar_lea.vmem %s558_s5, 128 }
  0x3a   : > { %161 = vadd.xlane.f32.xlu0 %v160_v1  ;;  %p352_p6 = scmp.ne.s32.totalorder %s558_s5, %s351_s14  ;;  %p611_p11 = scmp.ne.s32.totalorder %s606_s21, 0 }
  0x3b   : > { %s420_s13 = smov [#allocation5]  }
  0x3c   : > { %p353_p12 = pnand %p352_p6, %p611_p11  ;;  %s355_s16 = sshll.u32 %s420_s13, 4  ;;  %s356_s16 = int_to_ptr.vmem [resolvable:$false] %s355_s16 }
  0x3d   : > { %s357_s17 = scalar_lea.vmem %s356_s16, 256  ;;  %p358_p7 = scmp.lt.s32.totalorder %s558_s5, %s356_s16 }
  0x3e   : > { %p354_p13 = pneg %p353_p12  ;;  %p359_p10 = scmp.lt.s32.totalorder %s357_s17, %s351_s14 }
  0x40   : > { %p360_p2 = por %p359_p10, %p358_p7 }
  0x42   : > { %p361_p4 = pnand %p360_p2, %p354_p13 }
  0xc7   : > { %v162_v2 = vpop.xlane.xlu0 %161 }
  0xc8   : > { %v163_v3 = vmul.f32 0.03125, %v162_v2 }
  0xca   : > { %v164_v4 = vadd.f32 1e-06, %v163_v3 }
  0xcc   : > { %319 = vrsqrt.f32 %v164_v4 }
  0xd6   : > { %v320_v5 = vpop.eup %319 }
  0xd7   : > { %v166_v7 = vmul.f32 %v320_v5, %v159_v0 }
  0xd9   : > { %v174_v8 = vmul.f32 %v268_v6, %v166_v7 }
  0xdb   : > { %175 = vst [vmem:[%s158_s4] sm:$0xff] %v174_v8 }
  0xdc   : > { %364 = shalt.err (!%p361_p4)
}
  0xdd   : > { %s365_s19 = scalar_lea.hbm %s556_s7, 128  ;;  %s369_s25 = scalar_lea.hbm %s602_s2, 256 }
  0xde   : > { %p366_p5 = scmp.ne.s32.totalorder %s556_s7, %s365_s19  ;;  %p370_p0 = scmp.lt.u32.totalorder %s556_s7, %s602_s2 }
  0xdf   : > { %p371_p1 = scmp.lt.u32.totalorder %s369_s25, %s365_s19  ;;  %p373_p6 = scmp.lt.u32.totalorder %s365_s19, %s556_s7 }
  0xe0   : > { %p367_p8 = pnand %p366_p5, %p611_p11 }
  0xe1   : > { %p372_p3 = por %p371_p1, %p370_p0 }
  0xe2   : > { %p368_p9 = pneg %p367_p8 }
  0xe3   : > { %p374_p12 = por %p373_p6, %p372_p3 }
  0xe5   : > { %p375_p13 = pnand %p374_p12, %p368_p9 }
  0xe7   : > { %378 = shalt.err (!%p375_p13)
}
  0xe8   : > { %275 = dma.vmem_to_hbm [thread:$0]  (%p611_p11), %s558_s5, 128, %s556_s7, %s177_s8  }
  0xe9 PF: > { %s202_s29 = sand.u32 1, %s405_s9   ;;  %p612_p7 = scmp.ne.s32.totalorder %s607_s22, 0 }
  0xea   : > { %p613_p10 = scmp.ge.s32.totalorder %s417_s12, 2  ;;  %s203_s28 = scalar_lea.sflag [#allocation4], %s202_s29 }
  0xec   : > { %p282_p2 = pnand %p613_p10, %p612_p7 }
  0xee   : > { %400 = dma.done.wait (!%p282_p2), %s203_s28, 128  }
  0xef   : > { %402 = vsyncadd (!%p282_p2), %s203_s28, 4294967168  ;;  %p15_p4 = scmp.ge.s32.totalorder %s461_s15, 4   ;;  %s614_s9 = smov %s409_s10 }
  0xf0   : > { %s615_s10 = smov %s413_s11  ;;  %s616_s11 = smov %s473_s18 }
  0xf1   : > { %s617_s12 = smov %s461_s15  ;;  %17 = sbr.rel (!%p15_p4) target bundleno = 5 (0x5), region = 73 }
  0xf8   :  { %208 = vsyncpa [#allocation3], 1 }
  0xf9   :  { %210 = vsyncpa [#allocation3 + $0x1], 1 }
  0xfa   :  { %211 = vsyncpa [#allocation4], 1 }
  0xfb   :  { %213 = vsyncpa [#allocation4 + $0x1], 1 }

</bundles_post_ra>
